<compile_context>
chip_gen: v7x
topology: tpu7x:2x2x1
jax: 0.10.0
libtpu: 0.0.40
codegen_flags: <defaults>
</compile_context>

<pallas_src>
import functools

import jax
import jax.numpy as jnp
from jax import lax
from jax.experimental import pallas as pl
from jax.experimental.pallas import tpu as pltpu


_TARGET_TILE_BYTES = 2 * 1024 * 1024  # ~2 MiB tile -> ~8 MiB with in+out double-buffered


def _bin_dropout_kernel(seed_ref, x_ref, o_ref, *, thresh: int, block_elems: int):
    """Flip the sign of each element with probability p (= thresh / 2**32)."""
    rows, lanes = x_ref.shape

    # Globally unique per-element counter: tile offset + linear index in tile.
    row_ids = lax.broadcasted_iota(jnp.int32, (rows, lanes), 0).astype(jnp.uint32)
    col_ids = lax.broadcasted_iota(jnp.int32, (rows, lanes), 1).astype(jnp.uint32)
    tile_base = pl.program_id(0).astype(jnp.uint32) * jnp.uint32(block_elems)
    ctr = tile_base + row_ids * jnp.uint32(lanes) + col_ids

    # Counter-based hash (lowbias32 finalizer) keyed by the seed.  Integer VPU
    # ops only; portable to the CPU interpreter (no pltpu.prng_*).
    key = seed_ref[0].astype(jnp.uint32)
    h = ctr + key * jnp.uint32(0x9E3779B9)
    h = h ^ (h >> 16)
    h = h * jnp.uint32(0x7FEB352D)
    h = h ^ (h >> 15)
    h = h * jnp.uint32(0x846CA68B)
    h = h ^ (h >> 16)

    flip = h < jnp.uint32(thresh)  # Bernoulli(p)

    x = x_ref[...]
    if x_ref.dtype == jnp.float32:
        # Integer sign-bit XOR: no int->float convert, float compare or multiply.
        xb = lax.bitcast_convert_type(x, jnp.uint32)
        sign = jnp.where(flip, jnp.uint32(0x80000000), jnp.uint32(0))
        o_ref[...] = lax.bitcast_convert_type(xb ^ sign, jnp.float32)
    else:
        # TODO(synk): packed 2x-bf16-in-u32 sign-bit XOR for the v5e bf16 path.
        o_ref[...] = jnp.where(flip, -x, x)


def bin_dropout(x: jax.Array, p: float = 0.5, seed: int = 0,
                training: bool = True) -> jax.Array:
    """Pallas implementation of BinDropout.forward (sign-flip dropout)."""
    if p < 0.0 or p > 1.0:
        raise ValueError(
            "dropout probability has to be between 0 and 1, but got {}".format(p))
    if not training or p == 0.0:
        return x
    if p == 1.0:
        return -x  # flip probability 1 -> every sign flipped

    orig_shape = x.shape
    total = x.size
    elem_bytes = jnp.dtype(x.dtype).itemsize

    # Lane-dense 2-D view: last dim a large multiple of 128.
    lane = 128
    for cand in (1024, 512, 256):
        if total % cand == 0:
            lane = cand
            break
    pad = (-total) % lane
    flat = x.reshape(-1)
    if pad:
        flat = jnp.pad(flat, (0, pad))
    rows = flat.size // lane
    x2d = flat.reshape(rows, lane)

    # Row tiling: ~2 MiB tiles; row block multiple of 8 (or the full row count).
    target_rows = max(8, (_TARGET_TILE_BYTES // elem_bytes) // lane)
    if rows <= target_rows:
        tr = rows
    else:
        tr = max(8, (target_rows // 8) * 8)
    grid = (pl.cdiv(rows, tr),)

    thresh = min(int(round(p * (1 << 32))), (1 << 32) - 1)
    seed_arr = jnp.asarray([seed], dtype=jnp.int32)

    out2d = pl.pallas_call(
        functools.partial(_bin_dropout_kernel, thresh=thresh, block_elems=tr * lane),
        out_shape=jax.ShapeDtypeStruct(x2d.shape, x2d.dtype),
        grid=grid,
        in_specs=[
            pl.BlockSpec(memory_space=pltpu.MemorySpace.SMEM),  # seed scalar
            pl.BlockSpec((tr, lane), lambda i: (i, 0)),
        ],
        out_specs=pl.BlockSpec((tr, lane), lambda i: (i, 0)),
        compiler_params=pltpu.CompilerParams(
            dimension_semantics=("parallel",)),
        cost_estimate=pl.CostEstimate(
            flops=10 * total, transcendentals=0,
            bytes_accessed=2 * total * elem_bytes),
    )(seed_arr, x2d)

    out_flat = out2d.reshape(-1)
    if pad:
        out_flat = out_flat[:total]
    return out_flat.reshape(orig_shape)


if __name__ == "__main__":
    key = jax.random.PRNGKey(0)
    B, C, H, W = 2, 4, 16, 16
    x = jax.random.normal(key, (B, C, H, W), dtype=jnp.float32)

    # Training-mode forward (sign-flip dropout).
    y = jax.block_until_ready(bin_dropout(x, p=0.5, seed=1234, training=True))

    assert y.shape == x.shape and y.dtype == x.dtype
    # Every output element is exactly +x or -x (magnitudes preserved).
    assert bool(jnp.all((y == x) | (y == -x)))
    assert bool(jnp.all(jnp.abs(y) == jnp.abs(x)))
    # Flip fraction should be near p = 0.5.
    nz = x != 0
    frac = float(jnp.sum((y == -x) & nz) / jnp.sum(nz))
    assert 0.25 < frac < 0.75, frac

    # Eval-mode forward is identity.
    y_eval = jax.block_until_ready(bin_dropout(x, p=0.5, training=False))
    assert bool(jnp.array_equal(y_eval, x))

    print("KERNEL_OK")
</pallas_src>

<mosaic_0001>
module attributes {stable_mosaic.version = 11 : i64} {
  func.func @_bin_dropout_kernel(%arg0: i32, %arg1: memref<1xi32, #tpu.memory_space<smem>>, %arg2: memref<2x1024xf32, #tpu.memory_space<vmem>>, %arg3: memref<2x1024xf32, #tpu.memory_space<vmem>>) attributes {dimension_semantics = [#tpu.dimension_semantics<parallel>], iteration_bounds = array<i64: 1>, scalar_prefetch = 0 : i64, scratch_operands = 0 : i64, tpu.core_type = #tpu.core_type<tc>, window_params = [{transform_indices = @transform_0, window_bounds = array<i64: 1>}, {transform_indices = @transform_1, window_bounds = array<i64: 2, 1024>}, {transform_indices = @transform_2, window_bounds = array<i64: 2, 1024>}]} {
    %0 = tpu.iota {dimensions = array<i32: 0>} : vector<2x1024xi32>
    %1 = tpu.iota {dimensions = array<i32: 1>} : vector<2x1024xi32>
    %c2048_i32 = arith.constant 2048 : i32
    %2 = arith.muli %arg0, %c2048_i32 : i32
    %c1024_i32 = arith.constant 1024 : i32
    %3 = vector.broadcast %c1024_i32 : i32 to vector<2x1024xi32>
    %4 = arith.muli %0, %3 : vector<2x1024xi32>
    %5 = vector.broadcast %2 : i32 to vector<2x1024xi32>
    %6 = arith.addi %5, %4 : vector<2x1024xi32>
    %7 = arith.addi %6, %1 : vector<2x1024xi32>
    %c0 = arith.constant 0 : index
    %8 = memref.load %arg1[%c0] : memref<1xi32, #tpu.memory_space<smem>>
    %c-1640531527_i32 = arith.constant -1640531527 : i32
    %9 = arith.muli %8, %c-1640531527_i32 : i32
    %10 = vector.broadcast %9 : i32 to vector<2x1024xi32>
    %11 = arith.addi %7, %10 : vector<2x1024xi32>
    %c16_i32 = arith.constant 16 : i32
    %12 = vector.broadcast %c16_i32 : i32 to vector<2x1024xi32>
    %13 = arith.shrui %11, %12 : vector<2x1024xi32>
    %14 = arith.xori %11, %13 : vector<2x1024xi32>
    %c2146121005_i32 = arith.constant 2146121005 : i32
    %15 = vector.broadcast %c2146121005_i32 : i32 to vector<2x1024xi32>
    %16 = arith.muli %14, %15 : vector<2x1024xi32>
    %c15_i32 = arith.constant 15 : i32
    %17 = vector.broadcast %c15_i32 : i32 to vector<2x1024xi32>
    %18 = arith.shrui %16, %17 : vector<2x1024xi32>
    %19 = arith.xori %16, %18 : vector<2x1024xi32>
    %c-2073254261_i32 = arith.constant -2073254261 : i32
    %20 = vector.broadcast %c-2073254261_i32 : i32 to vector<2x1024xi32>
    %21 = arith.muli %19, %20 : vector<2x1024xi32>
    %c16_i32_0 = arith.constant 16 : i32
    %22 = vector.broadcast %c16_i32_0 : i32 to vector<2x1024xi32>
    %23 = arith.shrui %21, %22 : vector<2x1024xi32>
    %24 = arith.xori %21, %23 : vector<2x1024xi32>
    %c-2147483648_i32 = arith.constant -2147483648 : i32
    %25 = vector.broadcast %c-2147483648_i32 : i32 to vector<2x1024xi32>
    %26 = arith.cmpi ult, %24, %25 : vector<2x1024xi32>
    %c0_1 = arith.constant 0 : index
    %c0_2 = arith.constant 0 : index
    %27 = vector.load %arg2[%c0_1, %c0_2] : memref<2x1024xf32, #tpu.memory_space<vmem>>, vector<2x1024xf32>
    %28 = tpu.bitcast %27 : vector<2x1024xf32> -> vector<2x1024xi32>
    %c-2147483648_i32_3 = arith.constant -2147483648 : i32
    %c0_i32 = arith.constant 0 : i32
    %29 = vector.broadcast %c-2147483648_i32_3 : i32 to vector<2x1024xi32>
    %30 = vector.broadcast %c0_i32 : i32 to vector<2x1024xi32>
    %31 = arith.select %26, %29, %30 : vector<2x1024xi1>, vector<2x1024xi32>
    %32 = arith.xori %28, %31 : vector<2x1024xi32>
    %33 = tpu.bitcast %32 : vector<2x1024xi32> -> vector<2x1024xf32>
    %c0_4 = arith.constant 0 : index
    %c0_5 = arith.constant 0 : index
    %34 = vector.load %arg3[%c0_4, %c0_5] : memref<2x1024xf32, #tpu.memory_space<vmem>>, vector<2x1024xf32>
    tpu.vector_store %arg3[%c0_4, %c0_5], %33 {strides = array<i32>} : memref<2x1024xf32, #tpu.memory_space<vmem>>, vector<2x1024xf32>,
    return
  }
  func.func @transform_0(%arg0: i32) -> i32 {
    %c0_i32 = arith.constant 0 : i32
    %c0_i32_0 = arith.constant 0 : i32
    return %c0_i32 : i32
  }
  func.func @transform_1(%arg0: i32) -> (i32, i32) {
    %c0_i32 = arith.constant 0 : i32
    %c0_i32_0 = arith.constant 0 : i32
    return %arg0, %c0_i32 : i32, i32
  }
  func.func @transform_2(%arg0: i32) -> (i32, i32) {
    %c0_i32 = arith.constant 0 : i32
    %c0_i32_0 = arith.constant 0 : i32
    return %arg0, %c0_i32 : i32, i32
  }
}

</mosaic_0001>

<bundles_post_ra>
// kernel: tpu_custom_call.1
= control target key start
LH: loop header
LB: loop body
LE: loop exit
PB: predicated region body
PF: predicated region fallthrough
CT: control target
= control target key end

     0   :  { %8 = vsyncpa [#allocation4], 0  ;;  %s372_s0 = inlined_call_operand.<no memory space> [shape: s32[1], index: 0, kind: input, shape index: {}]   ;;  %s373_s1 = inlined_call_operand.hbm [shape: f32[2,1024], index: 1, kind: input, shape index: {}]   ;;  %s374_s2 = inlined_call_operand.hbm [shape: f32[2,1024], index: 2, kind: output, shape index: {}]  }
   0x1   :  { %9 = vsyncpa [#allocation5], 0  ;;  %s292_s9 = smov [#allocation3]   ;;  %s244_s13 = scalar_lea.hbm %s373_s1, 256 }
   0x2   :  { %s18_s10 = sshll.u32 %s292_s9, 4  ;;  %p245_p0 = scmp.ne.s32.totalorder %s373_s1, %s244_s13  ;;  %s19_s10 = int_to_ptr.vmem [resolvable:$true] %s18_s10 }
   0x3   :  { %p248_p1 = scmp.lt.u32.totalorder %s244_s13, %s373_s1 }
   0x5   :  { %p250_p2 = pnand %p248_p1, %p245_p0 }
   0x7   :  { %253 = shalt.err (!%p250_p2)
}
   0x8   :  { %s254_s18 = scalar_lea.vmem %s19_s10, 256  ;;  %p259_p4 = scmp.lt.s32.totalorder %s19_s10, %s19_s10 }
   0x9   :  { %p255_p3 = scmp.ne.s32.totalorder %s19_s10, %s254_s18  ;;  %p260_p5 = scmp.lt.s32.totalorder %s254_s18, %s254_s18 }
   0xb   :  { %p261_p6 = por %p260_p5, %p259_p4 }
   0xd   :  { %p262_p7 = pnand %p261_p6, %p255_p3 }
   0xf   :  { %265 = shalt.err (!%p262_p7)
}
  0x10   :  { %21 = dma.hbm_to_vmem [thread:$0]  %s373_s1, 256, %s19_s10, [#allocation4]  }
  0x11   :  { %288 = dma.done.wait [#allocation4], 256  }
  0x12   :  { %289 = vsyncadd [#allocation4], 4294967040  ;;  %v25_v0 = vlaneseq  ;;  %s49_s23 = smul.u32 2654435769, %s372_s0  ;;  %v293_v1 = vmov 1983009808  }
  0x13   :  { %v137_v2 = vunpack.c.l.s4 %v293_v1  ;;  %v131_v19 = vld [vmem:[#allocation3] sm:$0xff]  ;;  %v336_v40 = vld [vmem:[#allocation3 + $0x8] sm:$0xff]  ;;  %s295_s0 = smov [#allocation6]  }
  0x14   :  { %v26_v3 = vshrl.u32 %v25_v0, 7  ;;  %v28_v4 = vand.u32 127, %v25_v0  ;;  %v50_v5 = vstv %s49_s23  ;;  %v135_v28 = vcombine.high %v131_v19, %v131_v19  ;;  %s229_s1 = sshll.u32 %s295_s0, 4  ;;  %s230_s1 = int_to_ptr.vmem [resolvable:$true] %s229_s1 }
  0x15   :  { %v138_v6 = vunpack.c.0.s8 %v137_v2  ;;  %v152_v52 = vcombine.high %v336_v40, %v336_v40  ;;  %s266_s24 = scalar_lea.vmem %s230_s1, 256  ;;  %p271_p9 = scmp.lt.s32.totalorder %s230_s1, %s230_s1 }
  0x16   :  { %v29_v7 = vadd.s32 128, %v28_v4  ;;  %v30_v8 = vadd.s32 256, %v28_v4  ;;  %v31_v9 = vadd.s32 384, %v28_v4  ;;  %v37_v10 = vmul.u32 1024, %v26_v3  ;;  %p267_p8 = scmp.ne.s32.totalorder %s230_s1, %s266_s24  ;;  %p272_p10 = scmp.lt.s32.totalorder %s266_s24, %s266_s24 }
  0x17   :  { %v326_v11 = vsub.s32 %v138_v6, %v26_v3  ;;  %v32_v12 = vadd.s32 512, %v28_v4  ;;  %v33_v13 = vadd.s32 640, %v28_v4  ;;  %v34_v14 = vadd.s32 768, %v28_v4 }
  0x18   :  { %v40_v15 = vadd.s32 %v37_v10, %v28_v4  ;;  %v41_v16 = vadd.s32 %v37_v10, %v29_v7  ;;  %v42_v17 = vadd.s32 %v37_v10, %v30_v8  ;;  %v43_v18 = vadd.s32 %v37_v10, %v31_v9  ;;  %p273_p11 = por %p272_p10, %p271_p9 }
  0x19   :  { %v35_v20 = vadd.s32 896, %v28_v4  ;;  %v44_v21 = vadd.s32 %v37_v10, %v32_v12  ;;  %v45_v22 = vadd.s32 %v37_v10, %v33_v13  ;;  %v46_v23 = vadd.s32 %v37_v10, %v34_v14 }
  0x1a   :  { %v51_v24 = vadd.s32 %v50_v5, %v40_v15  ;;  %v52_v25 = vadd.s32 %v50_v5, %v41_v16  ;;  %v53_v26 = vadd.s32 %v50_v5, %v42_v17  ;;  %v54_v27 = vadd.s32 %v50_v5, %v43_v18  ;;  %p274_p12 = pnand %p273_p11, %p267_p8 }
  0x1b   :  { %v329_v29 = vrot.slane %v131_v19, %v326_v11  ;;  %v47_v30 = vadd.s32 %v37_v10, %v35_v20  ;;  %v55_v31 = vadd.s32 %v50_v5, %v44_v21  ;;  %v332_v36 = vrot.slane %v135_v28, %v326_v11 }
  0x1c   :  { %v59_v32 = vshrl.u32 %v51_v24, 16  ;;  %v60_v33 = vshrl.u32 %v52_v25, 16  ;;  %v61_v34 = vshrl.u32 %v53_v26, 16  ;;  %v62_v35 = vshrl.u32 %v54_v27, 16 }
  0x1d   :  { %v150_v37 = vcombine.high %v329_v29, %v329_v29  ;;  %v56_v38 = vadd.s32 %v50_v5, %v45_v22  ;;  %v57_v39 = vadd.s32 %v50_v5, %v46_v23  ;;  %v151_v45 = vcombine.high %v332_v36, %v332_v36 }
  0x1e   :  { %v67_v41 = vxor.u32 %v59_v32, %v51_v24  ;;  %v68_v42 = vxor.u32 %v60_v33, %v52_v25  ;;  %v69_v43 = vxor.u32 %v61_v34, %v53_v26  ;;  %v70_v44 = vxor.u32 %v62_v35, %v54_v27 }
  0x1f   :  { %v58_v46 = vadd.s32 %v50_v5, %v47_v30  ;;  %v63_v47 = vshrl.u32 %v55_v31, 16  ;;  %v64_v48 = vshrl.u32 %v56_v38, 16  ;;  %v65_v51 = vshrl.u32 %v57_v39, 16 }
  0x20   :  { %v75_v49 = vmul.u32 2146121005, %v67_v41  ;;  %v76_v50 = vmul.u32 2146121005, %v68_v42 }
  0x21   :  { %v77_v53 = vmul.u32 2146121005, %v69_v43  ;;  %v78_v54 = vmul.u32 2146121005, %v70_v44  ;;  %v66_v55 = vshrl.u32 %v58_v46, 16  ;;  %v71_v56 = vxor.u32 %v63_v47, %v55_v31 }
  0x22   :  { %v83_v57 = vshrl.u32 %v75_v49, 15  ;;  %v84_v58 = vshrl.u32 %v76_v50, 15  ;;  %v72_v59 = vxor.u32 %v64_v48, %v56_v38  ;;  %v73_v60 = vxor.u32 %v65_v51, %v57_v39 }
  0x23   :  { %v85_v61 = vshrl.u32 %v77_v53, 15  ;;  %v86_v62 = vshrl.u32 %v78_v54, 15  ;;  %v74_v63 = vxor.u32 %v66_v55, %v58_v46  ;;  %v79_v0 = vmul.u32 2146121005, %v71_v56 }
  0x24   :  { %v91_v1 = vxor.u32 %v83_v57, %v75_v49  ;;  %v92_v2 = vxor.u32 %v84_v58, %v76_v50  ;;  %v80_v3 = vmul.u32 2146121005, %v72_v59  ;;  %v81_v4 = vmul.u32 2146121005, %v73_v60 }
  0x25   :  { %v93_v5 = vxor.u32 %v85_v61, %v77_v53  ;;  %v94_v6 = vxor.u32 %v86_v62, %v78_v54  ;;  %v82_v7 = vmul.u32 2146121005, %v74_v63  ;;  %v87_v8 = vshrl.u32 %v79_v0, 15 }
  0x26   :  { %v99_v9 = vmul.u32 2221713035, %v91_v1  ;;  %v100_v10 = vmul.u32 2221713035, %v92_v2  ;;  %v88_v12 = vshrl.u32 %v80_v3, 15  ;;  %v89_v13 = vshrl.u32 %v81_v4, 15 }
  0x27   :  { %v101_v14 = vmul.u32 2221713035, %v93_v5  ;;  %v102_v15 = vmul.u32 2221713035, %v94_v6  ;;  %v90_v16 = vshrl.u32 %v82_v7, 15  ;;  %v95_v17 = vxor.u32 %v87_v8, %v79_v0 }
  0x28   :  { %v107_v18 = vshrl.u32 %v99_v9, 16  ;;  %v108_v19 = vshrl.u32 %v100_v10, 16  ;;  %v96_v20 = vxor.u32 %v88_v12, %v80_v3  ;;  %v97_v21 = vxor.u32 %v89_v13, %v81_v4 }
  0x29   :  { %v109_v22 = vshrl.u32 %v101_v14, 16  ;;  %v110_v23 = vshrl.u32 %v102_v15, 16  ;;  %v98_v24 = vxor.u32 %v90_v16, %v82_v7  ;;  %v103_v25 = vmul.u32 2221713035, %v95_v17 }
  0x2a   :  { %v115_v26 = vxor.u32 %v107_v18, %v99_v9  ;;  %v116_v27 = vxor.u32 %v108_v19, %v100_v10  ;;  %v104_v28 = vmul.u32 2221713035, %v96_v20  ;;  %v105_v30 = vmul.u32 2221713035, %v97_v21 }
  0x2b   :  { %v117_v31 = vxor.u32 %v109_v22, %v101_v14  ;;  %v118_v32 = vxor.u32 %v110_v23, %v102_v15  ;;  %v106_v33 = vmul.u32 2221713035, %v98_v24  ;;  %v111_v34 = vshrl.u32 %v103_v25, 16 }
  0x2c   :  { %vm123_vm0 = vcmp.lt.u32.totalorder %v115_v26, 2147483648  ;;  %vm124_vm1 = vcmp.lt.u32.totalorder %v116_v27, 2147483648  ;;  %v112_v35 = vshrl.u32 %v104_v28, 16  ;;  %v113_v38 = vshrl.u32 %v105_v30, 16 }
  0x2d   :  { %vm125_vm2 = vcmp.lt.u32.totalorder %v117_v31, 2147483648  ;;  %vm126_vm3 = vcmp.lt.u32.totalorder %v118_v32, 2147483648  ;;  %v294_v39 = vmov 0   ;;  %v114_v50 = vshrl.u32 %v106_v33, 16 }
  0x2e   :  { %v169_v41 = vsel %vm123_vm0, 2147483648, %v294_v39  ;;  %v170_v42 = vsel %vm124_vm1, 2147483648, %v294_v39  ;;  %v171_v43 = vsel %vm125_vm2, 2147483648, %v294_v39  ;;  %v172_v44 = vsel %vm126_vm3, 2147483648, %v294_v39 }
  0x2f   :  { %v177_v46 = vxor.u32 %v169_v41, %v329_v29  ;;  %v178_v47 = vxor.u32 %v170_v42, %v150_v37  ;;  %v179_v48 = vxor.u32 %v171_v43, %v332_v36  ;;  %v180_v49 = vxor.u32 %v172_v44, %v151_v45 }
  0x30   :  { %v119_v51 = vxor.u32 %v111_v34, %v103_v25  ;;  %v120_v54 = vxor.u32 %v112_v35, %v104_v28  ;;  %v121_v55 = vxor.u32 %v113_v38, %v105_v30  ;;  %v159_v56 = vrot.slane %v336_v40, %v326_v11 }
  0x31   :  { %v185_v53 = vcombine.low %v177_v46, %v178_v47  ;;  %v186_v57 = vcombine.low %v179_v48, %v180_v49  ;;  %v122_v58 = vxor.u32 %v114_v50, %v106_v33  ;;  %v166_v29 = vrot.slane %v152_v52, %v326_v11 }
  0x32   :  { %vm127_vm4 = vcmp.lt.u32.totalorder %v119_v51, 2147483648  ;;  %vm128_vm5 = vcmp.lt.u32.totalorder %v120_v54, 2147483648  ;;  %vm129_vm6 = vcmp.lt.u32.totalorder %v121_v55, 2147483648  ;;  %v167_v36 = vcombine.high %v159_v56, %v159_v56 }
  0x33   :  { %v193_v37 = vrot.slane %v185_v53, %v326_v11  ;;  %v200_v45 = vrot.slane %v186_v57, %v326_v11  ;;  %vm130_vm7 = vcmp.lt.u32.totalorder %v122_v58, 2147483648  ;;  %v168_v59 = vcombine.high %v166_v29, %v166_v29 }
  0x34   :  { %v173_v60 = vsel %vm127_vm4, 2147483648, %v294_v39  ;;  %v174_v61 = vsel %vm128_vm5, 2147483648, %v294_v39  ;;  %v175_v62 = vsel %vm129_vm6, 2147483648, %v294_v39  ;;  %v176_v63 = vsel %vm130_vm7, 2147483648, %v294_v39 }
  0x35   :  { %v181_v0 = vxor.u32 %v173_v60, %v159_v56  ;;  %v201_v1 = vcombine.low %v193_v37, %v200_v45  ;;  %v182_v2 = vxor.u32 %v174_v61, %v167_v36  ;;  %v183_v3 = vxor.u32 %v175_v62, %v166_v29 }
  0x36   :  { %v184_v4 = vxor.u32 %v176_v63, %v168_v59 }
  0x37   :  { %221 = vst [vmem:[#allocation6] sm:$0xff] %v201_v1  ;;  %v202_v40 = vcombine.low %v181_v0, %v182_v2 }
  0x38   :  { %v203_v52 = vcombine.low %v183_v3, %v184_v4 }
  0x39   :  { %v210_v5 = vrot.slane %v202_v40, %v326_v11 }
  0x3a   :  { %v217_v6 = vrot.slane %v203_v52, %v326_v11 }
  0x3c   :  { %v218_v7 = vcombine.low %v210_v5, %v217_v6 }
  0x3e   :  { %222 = vst [vmem:[#allocation6 + $0x8] sm:$0xff] %v218_v7 }
  0x3f   :  { %277 = shalt.err (!%p274_p12)
}
  0x40   :  { %s278_s27 = scalar_lea.hbm %s374_s2, 256 }
  0x41   :  { %p279_p13 = scmp.ne.s32.totalorder %s374_s2, %s278_s27  ;;  %p282_p0 = scmp.lt.u32.totalorder %s278_s27, %s374_s2 }
  0x43   :  { %p284_p1 = pnand %p282_p0, %p279_p13 }
  0x45   :  { %287 = shalt.err (!%p284_p1)
}
  0x46   :  { %232 = dma.vmem_to_hbm [thread:$0]  %s230_s1, 256, %s374_s2, [#allocation5]  }
  0x47   :  { %290 = dma.done.wait [#allocation5], 256  }
  0x48   :  { %291 = vsyncadd [#allocation5], 4294967040 }
  0x49   :  { %236 = vsyncpa [#allocation4], 1 }
  0x4a   :  { %237 = vsyncpa [#allocation5], 1 }

</bundles_post_ra>
